<compile_context>
chip_gen: v5e
topology: v5e:2x2
jax: 0.10.0
libtpu: 0.0.40
codegen_flags: <defaults>
</compile_context>

<pallas_src>
import jax
import jax.numpy as jnp
from jax.experimental import pallas as pl
from jax.experimental.pallas import tpu as pltpu


def cnn_kernel(idx_ref, emb_ref, wt_ref, bias_ref, out_ref):
    """Single-invocation kernel: per-vocab max-relu table, lookup via one
    compare-select, linear layer on the MXU, log_softmax. Fully batched."""
    idx = idx_ref[...]            # (B, L) int32
    emb = emb_ref[...]            # (V, E) f32
    wt = wt_ref[...]              # (L, C) f32  (= Linear.weight.T)
    bias = bias_ref[...]          # (1, C) f32

    B, L = idx.shape
    V, _E = emb.shape

    # Per-vocab pooled value: relu after the max (mathematically identical to
    # max-of-relu, but the relu now touches (V,) instead of (V, E)).
    t = jnp.maximum(jnp.max(emb, axis=1), 0.0)                        # (V,)

    # pooled[b, l] = t[idx[b, l]] via a single compare-select against one
    # broadcasted iota (no MXU work, no per-batch one-hot).
    # Exactly-one-hot per (b, l) for in-range ids, so sum == select.
    iota_v = jax.lax.broadcasted_iota(jnp.int32, (B, L, V), 2)        # (B, L, V)
    idx3 = jax.lax.broadcast_in_dim(idx, (B, L, V), (0, 1))           # (B, L, V)
    pooled = jnp.sum(jnp.where(idx3 == iota_v, t, 0.0), axis=2)       # (B, L)

    # Linear layer: one batched (B, L) @ (L, C) MXU op + bias.
    logits = jnp.dot(pooled, wt, preferred_element_type=jnp.float32) + bias  # (B, C)

    # log_softmax over the class dim, written directly (no concatenate).
    m = jnp.max(logits, axis=1, keepdims=True)
    shifted = logits - m
    lse = jnp.log(jnp.sum(jnp.exp(shifted), axis=1, keepdims=True))
    out_ref[...] = shifted - lse                                      # (B, C)


def cnn_forward(inputs, emb_table, lin_w, lin_b):
    """inputs: (B, L) int32 token ids.  lin_w: (C, L) as in nn.Linear.  Returns (B, C)."""
    B, L = inputs.shape
    C = lin_w.shape[0]
    wt = lin_w.T                                   # (L, C)   (glue: transpose in plain JAX)
    bias = lin_b.reshape(1, C)                     # (1, C)

    # TODO(synk): for realistic vocab sizes, tile V over an 'arbitrary' grid axis
    # (running max into the per-vocab table) or DMA-gather only referenced rows,
    # with idx scalar-prefetched into SMEM; at these toy sizes everything fits
    # comfortably in VMEM (well under v7x's 32 MiB scoped limit), so a single
    # grid-less invocation with resident operands is the fastest layout.
    vmem = pl.BlockSpec(memory_space=pltpu.MemorySpace.VMEM)
    return pl.pallas_call(
        cnn_kernel,
        out_shape=jax.ShapeDtypeStruct((B, C), jnp.float32),
        in_specs=[vmem, vmem, vmem, vmem],
        out_specs=vmem,
    )(inputs.astype(jnp.int32), emb_table, wt, bias)


def cnn_reference(inputs, emb_table, lin_w, lin_b):
    e = emb_table[inputs]                          # (B, L, E)
    a = jnp.maximum(e, 0.0)
    pooled = jnp.max(a, axis=2)                    # (B, L)
    logits = jnp.dot(pooled, lin_w.T, precision="highest") + lin_b
    return jax.nn.log_softmax(logits, axis=1)


if __name__ == "__main__":
    # Small shapes consistent with the module.  The reference forward only
    # type-checks when seq_len == num_filter (pooling is over the embedding
    # dim), so we pick L == num_filter.
    vocab_size, embedding_dim, num_filter, num_class = 16, 4, 8, 2
    batch, seq_len = 2, num_filter                 # seq_len must equal num_filter
    # filter_size = 3  # conv1d is defined but unused in the reference forward

    key = jax.random.PRNGKey(0)
    k_idx, k_emb, k_w, k_b = jax.random.split(key, 4)

    inputs = jax.random.randint(k_idx, (batch, seq_len), 0, vocab_size, dtype=jnp.int32)
    emb_table = jax.random.normal(k_emb, (vocab_size, embedding_dim), dtype=jnp.float32)
    lin_w = jax.random.uniform(k_w, (num_class, num_filter), dtype=jnp.float32,
                               minval=-0.3, maxval=0.3)
    lin_b = jax.random.uniform(k_b, (num_class,), dtype=jnp.float32,
                               minval=-0.3, maxval=0.3)

    out = cnn_forward(inputs, emb_table, lin_w, lin_b)
    out = jax.block_until_ready(out)

    ref = cnn_reference(inputs, emb_table, lin_w, lin_b)
    assert out.shape == (batch, num_class)
    assert jnp.allclose(out, ref, atol=1e-2, rtol=1e-2), (out, ref)

    print("KERNEL_OK")
</pallas_src>

<mosaic_0001>
module attributes {stable_mosaic.version = 11 : i64} {
  func.func @cnn_kernel(%arg0: memref<2x8xi32, #tpu.memory_space<vmem>>, %arg1: memref<16x4xf32, #tpu.memory_space<vmem>>, %arg2: memref<8x2xf32, #tpu.memory_space<vmem>>, %arg3: memref<1x2xf32, #tpu.memory_space<vmem>>, %arg4: memref<2x2xf32, #tpu.memory_space<vmem>>) attributes {dimension_semantics = [], scalar_prefetch = 0 : i64, scratch_operands = 0 : i64, tpu.core_type = #tpu.core_type<tc>} {
    %c0 = arith.constant 0 : index
    %c0_0 = arith.constant 0 : index
    %0 = vector.load %arg0[%c0, %c0_0] : memref<2x8xi32, #tpu.memory_space<vmem>>, vector<2x8xi32>
    %c0_1 = arith.constant 0 : index
    %c0_2 = arith.constant 0 : index
    %1 = vector.load %arg1[%c0_1, %c0_2] : memref<16x4xf32, #tpu.memory_space<vmem>>, vector<16x4xf32>
    %c0_3 = arith.constant 0 : index
    %c0_4 = arith.constant 0 : index
    %2 = vector.load %arg2[%c0_3, %c0_4] : memref<8x2xf32, #tpu.memory_space<vmem>>, vector<8x2xf32>
    %c0_5 = arith.constant 0 : index
    %c0_6 = arith.constant 0 : index
    %3 = vector.load %arg3[%c0_5, %c0_6] : memref<1x2xf32, #tpu.memory_space<vmem>>, vector<1x2xf32>
    %cst = arith.constant dense<0xFF800000> : vector<16xf32>
    %4 = vector.multi_reduction <maximumf>, %1, %cst [1] : vector<16x4xf32> to vector<16xf32>
    %cst_7 = arith.constant 0.000000e+00 : f32
    %5 = vector.broadcast %cst_7 : f32 to vector<16xf32>
    %6 = arith.maximumf %4, %5 : vector<16xf32>
    %7 = tpu.iota {dimensions = array<i32: 2>} : vector<2x8x16xi32>
    %8 = vector.shape_cast %0 : vector<2x8xi32> to vector<2x8x1xi32>
    %9 = vector.broadcast %8 : vector<2x8x1xi32> to vector<2x8x16xi32>
    %10 = arith.cmpi eq, %9, %7 : vector<2x8x16xi32>
    %cst_8 = arith.constant 0.000000e+00 : f32
    %11 = vector.shape_cast %6 : vector<16xf32> to vector<1x1x16xf32>
    %12 = vector.broadcast %11 : vector<1x1x16xf32> to vector<2x8x16xf32>
    %13 = vector.broadcast %cst_8 : f32 to vector<2x8x16xf32>
    %14 = arith.select %10, %12, %13 : vector<2x8x16xi1>, vector<2x8x16xf32>
    %cst_9 = arith.constant dense<0.000000e+00> : vector<2x8xf32>
    %15 = vector.multi_reduction <add>, %14, %cst_9 [2] : vector<2x8x16xf32> to vector<2x8xf32>
    %cst_10 = arith.constant dense<0.000000e+00> : vector<2x2xf32>
    %16 = tpu.matmul %15, %2, %cst_10 {dimension_numbers = #tpu.dot_dimension_numbers<[1], [0], [0], [1], [0, 0, 1, 1], [], []>} : vector<2x8xf32>, vector<8x2xf32>, vector<2x2xf32> -> vector<2x2xf32>
    %17 = vector.broadcast %3 : vector<1x2xf32> to vector<2x2xf32>
    %18 = arith.addf %16, %17 : vector<2x2xf32>
    %cst_11 = arith.constant dense<0xFF800000> : vector<2xf32>
    %19 = vector.multi_reduction <maximumf>, %18, %cst_11 [1] : vector<2x2xf32> to vector<2xf32>
    %20 = vector.shape_cast %19 : vector<2xf32> to vector<2x1xf32>
    %21 = vector.broadcast %20 : vector<2x1xf32> to vector<2x2xf32>
    %22 = arith.subf %18, %21 : vector<2x2xf32>
    %23 = math.exp %22 : vector<2x2xf32>
    %cst_12 = arith.constant dense<0.000000e+00> : vector<2xf32>
    %24 = vector.multi_reduction <add>, %23, %cst_12 [1] : vector<2x2xf32> to vector<2xf32>
    %25 = vector.shape_cast %24 : vector<2xf32> to vector<2x1xf32>
    %26 = math.log %25 : vector<2x1xf32>
    %27 = vector.broadcast %26 : vector<2x1xf32> to vector<2x2xf32>
    %28 = arith.subf %22, %27 : vector<2x2xf32>
    %c0_13 = arith.constant 0 : index
    %c0_14 = arith.constant 0 : index
    %29 = vector.load %arg4[%c0_13, %c0_14] : memref<2x2xf32, #tpu.memory_space<vmem>>, vector<2x2xf32>
    tpu.vector_store %arg4[%c0_13, %c0_14], %28 {strides = array<i32>} : memref<2x2xf32, #tpu.memory_space<vmem>>, vector<2x2xf32>,
    return
  }
}

</mosaic_0001>

<bundles_post_ra>
// kernel: tpu_custom_call.1
= control target key start
LH: loop header
LB: loop body
LE: loop exit
PB: predicated region body
PF: predicated region fallthrough
CT: control target
= control target key end

     0   :  { %vm23_vm0 = vcmask 31744   ;;  %v32_v1 = vlaneseq  ;;  %s223_s0 = inlined_call_operand.vmem [shape: s32[2,8], index: 0, kind: input, shape index: {}]   ;;  %s224_s1 = inlined_call_operand.vmem [shape: f32[16,4], index: 1, kind: input, shape index: {}]   ;;  %s225_s2 = inlined_call_operand.vmem [shape: f32[8,2], index: 2, kind: input, shape index: {}]   ;;  %s226_s3 = inlined_call_operand.vmem [shape: f32[1,2], index: 3, kind: input, shape index: {}]   ;;  %s227_s4 = inlined_call_operand.hbm [shape: f32[2,2], index: 4, kind: output, shape index: {}]  }
   0x1   :  { %v19_v0 = vld [vmem:[%s224_s1] sm:$0xff] }
   0x2   :  { %v24_v2 = vsel %vm23_vm0, %v19_v0, -inf  ;;  %v36_v3 = vshrl.u32 %v32_v1, 7 }
   0x3   :  { %25 = vmax.xlane.f32.xlu0 %v24_v2 }
   0x4   :  { %9 = vsyncpa [#allocation3], 0  ;;  %143 = vset.pattern.permute.xlu1 %v36_v3  ;;  %v20_v4 = vld [vmem:[%s224_s1 + $0x8] sm:$0xff]  ;;  %144 = vset.pattern.permute.xlu0 %v36_v3  ;;  %v18_v5 = vld [vmem:[%s223_s0] sm:$0x3]  ;;  %v33_v10 = vand.u32 127, %v32_v1 }
   0x5   :  { %v27_v6 = vsel %vm23_vm0, %v20_v4, -inf  ;;  %v34_v7 = vperm.slane %v18_v5, 0  ;;  %v41_v8 = vperm.slane %v18_v5, 1  ;;  %vm55_vm1 = vcmask 130112   ;;  %v21_v24 = vld [vmem:[%s225_s2] sm:$0xff]  ;;  %s176_s2 = smov [#allocation2]  }
   0x6   :  { %v53_v12 = vadd.s32 4294967288, %v33_v10  ;;  %vm73_vm3 = vcmask 130048   ;;  %106 = vmatpush.msra.mxu0 %v21_v24  ;;  %vm57_vm5 = vcmask 1041409   ;;  %vm88_vm6 = vcmask 64512   ;;  %v145_v30 = vld [vmem:[%s226_s3] ss:$0 sm:$0xff] }
   0x7   :  { %vm111_vm7 = vcmask 9216   ;;  %s130_s23 = sshll.u32 %s176_s2, 4  ;;  %s132_s25 = sshll.u32 %s227_s4, 4  ;;  %s131_s23 = int_to_ptr.vmem [resolvable:$true] %s130_s23  ;;  %s133_s25 = int_to_ptr.hbm [resolvable:$true] %s132_s25 }
   0xb   :  { %28 = vmax.xlane.f32.xlu0 %v27_v6 }
   0xc   :  { %39 = vperm.xlu1 %143, %v34_v7  }
  0x14   :  { %46 = vperm.xlu1 %143, %v41_v8  }
  0x76   :  { %v26_v9 = vpop.xlane.xlu0 %25 }
  0x77   :  { %v30_v11 = vmax.f32 %v26_v9, 0.0 }
  0x79   :  { %v52_v16 = vperm.slane %v30_v11, %v33_v10 }
  0x7e   :  { %v29_v13 = vpop.xlane.xlu0 %28  ;;  %v40_v15 = vpop.permute.xlu1 %39 }
  0x7f   :  { %v31_v14 = vmax.f32 %v29_v13, 0.0  ;;  %vm48_vm2 = vcmp.eq.s32.totalorder %v40_v15, %v33_v10 }
  0x81   :  { %v54_v17 = vperm.slane %v31_v14, %v53_v12 }
  0x83   :  { %v56_v18 = vsel %vm55_vm1, %v54_v17, %v52_v16 }
  0x84   :  { %v71_v19 = vsel %vm48_vm2, %v56_v18, 0.0 }
  0x85   :  { %v74_v20 = vsel %vm73_vm3, %v71_v19, 0.0 }
  0x86   :  { %75 = vadd.xlane.f32.xlu2 %v74_v20  ;;  %v47_v21 = vpop.permute.xlu1 %46 }
  0x87   :  { %vm49_vm4 = vcmp.eq.s32.totalorder %v47_v21, %v33_v10 }
  0x88   :  { %v72_v22 = vsel %vm49_vm4, %v56_v18, 0.0 }
  0x89   :  { %v77_v23 = vsel %vm73_vm3, %v72_v22, 0.0 }
  0x8e   :  { %78 = vadd.xlane.f32.xlu2 %v77_v23 }
  0xf9   :  { %v76_v25 = vpop.xlane.xlu2 %75 }
  0xfa   :  { %v85_v27 = vperm.slane %v76_v25, %v33_v10 }
 0x101   :  { %v79_v26 = vpop.xlane.xlu2 %78 }
 0x102   :  { %v86_v28 = vperm.slane %v79_v26, %v33_v10 }
 0x104   :  { %v87_v29 = vsel %vm57_vm5, %v86_v28, %v85_v27 }
 0x105   :  { %141 = vmatmul.msk.f32.vlgmr.msra.gmra.mxu0 %vm88_vm6, %v87_v29 }
 0x182   :  { %v108_v31 = vpop.f32.mrf.mxu0 }
 0x183   :  { %v109_v32 = vadd.f32 %v145_v30, %v108_v31 }
 0x185   :  { %v112_v33 = vsel %vm111_vm7, %v109_v32, -inf }
 0x186   :  { %113 = vmax.xlane.f32.xlu0 %v112_v33 }
 0x1f9   :  { %v114_v34 = vpop.xlane.xlu0 %113 }
 0x1fa   :  { %v115_v35 = vsub.f32 %v109_v32, %v114_v34 }
 0x1fc   :  { %v116_v36 = vmul.f32 1.442695, %v115_v35 }
 0x1fe   :  { %146 = vpow2.f32 %v116_v36 }
 0x204   :  { %v147_v37 = vpop.eup %146 }
 0x205   :  { %v118_v38 = vsel %vm111_vm7, %v147_v37, 0.0 }
 0x206   :  { %119 = vadd.xlane.f32.xlu1 %v118_v38 }
 0x279   :  { %v120_v39 = vpop.xlane.xlu1 %119 }
 0x27a   :  { %148 = vlog2.f32 %v120_v39 }
 0x280   :  { %v149_v40 = vpop.eup %148 }
 0x281   :  { %v122_v41 = vmul.f32 0.6931472, %v149_v40 }
 0x283   :  { %v123_v42 = vsub.f32 %v115_v35, %v122_v41 }
 0x285   :  { %124 = vst.msk [vmem:[#allocation2] sm:$0x3] %vm111_vm7, %v123_v42 }
 0x286   :  { %135 = dma.vmem_to_hbm [thread:$0]  %s131_s23, 32, %s133_s25, [#allocation3]  }
 0x287   :  { %174 = dma.done.wait [#allocation3], 32  }
 0x288   :  { %175 = vsyncadd [#allocation3], 4294967264 }
 0x289   :  { %140 = vsyncpa [#allocation3], 1 }

</bundles_post_ra>
